<compile_context>
chip_gen: v6e
topology: v6e:2x2x1
jax: 0.10.0
libtpu: 0.0.40
codegen_flags: <defaults>
</compile_context>

<pallas_src>
import functools

import jax
import jax.numpy as jnp
from jax import lax
from jax.experimental import pallas as pl
from jax.experimental.pallas import tpu as pltpu


_ACT = {
    "relu": lambda t: jnp.maximum(t, 0),
    "gelu": jax.nn.gelu,
    "tanh": jnp.tanh,
}


# ---------------------------------------------------------------------------
# Kernels
# ---------------------------------------------------------------------------
def _proj_kernel(x_ref, xt_ref, wu_ref, bu_ref, wv_ref, bv_ref,
                 w2u_ref, w2v_ref, b2_ref, au_ref, bvt_ref, *, act):
    """Per-batch projections; one grid step per batch element.

    x_ref  : (S, E) bf16     xt_ref : (E, S) bf16  (same data, pre-transposed)
    wu_ref : (E, H) bf16     bu_ref : (1, H) f32
    wv_ref : (H, E) bf16     bv_ref : (H, 1) f32
    w2u_ref: (H, H) bf16     w2v_ref: (H, H) bf16    b2_ref : (1, H) f32
    au_ref : (S, H) pair_dtype    Au  = u  @ W2u.T + b2
    bvt_ref: (H, S) pair_dtype    BvT = W2v @ v.T     (no in-kernel transpose)
    """
    u = act(jnp.dot(x_ref[...], wu_ref[...],
                    preferred_element_type=jnp.float32) + bu_ref[...])
    vt = act(jnp.dot(wv_ref[...], xt_ref[...],
                     preferred_element_type=jnp.float32) + bv_ref[...])
    au = jnp.dot(u.astype(jnp.bfloat16), w2u_ref[...],
                 preferred_element_type=jnp.float32) + b2_ref[...]
    bvt = jnp.dot(w2v_ref[...], vt.astype(jnp.bfloat16),
                  preferred_element_type=jnp.float32)
    au_ref[...] = au.astype(au_ref.dtype)
    bvt_ref[...] = bvt.astype(bvt_ref.dtype)


def _pairwise_kernel(au_ref, bvt_ref, embb_ref, out_ref, *, act):
    """One (batch b, src-token tile i) grid step.

    au_ref  : (TI, H)      pair_dtype  Au rows for this tile
    bvt_ref : (H, S)       pair_dtype  BvT of batch b (resident across i)
    embb_ref: (TI, Rp, H)  bf16        emb, pre-broadcast (constant block)
    out_ref : (TI, Rp, S)  f32         (src, label, dst) output tile
    """
    # p[t, h, j] = act(Au[t, h] + BvT[h, j])  -- (TI, H, S), MXU-ready layout.
    p = act(au_ref[...][:, :, None] + bvt_ref[...][None, :, :])
    p = p.astype(jnp.bfloat16)
    # out[t, r, j] = sum_h emb[r, h] * p[t, h, j]
    # NN batched matmul (LHS contracts last dim, RHS second-to-last): no
    # operand transposes; result is stored as one unmasked full block.
    out = lax.dot_general(embb_ref[...], p, (((2,), (1,)), ((0,), (0,))),
                          preferred_element_type=jnp.float32)
    out_ref[...] = out.astype(out_ref.dtype)


# ---------------------------------------------------------------------------
# Chip-aware helpers
# ---------------------------------------------------------------------------
def _chip_info():
    """Return (physical VMEM bytes, TPU generation). Conservative fallbacks."""
    kind = ""
    try:
        kind = jax.devices()[0].device_kind.lower()
    except Exception:
        pass
    gen = 6
    for g in (7, 6, 5, 4, 3, 2):
        if "v%d" % g in kind:
            gen = g
            break
    vmem_cap = 0
    try:
        vmem_cap = int(pltpu.get_tpu_info().vmem_capacity_bytes)
    except Exception:
        vmem_cap = 0
    if vmem_cap <= 0:
        vmem_cap = (64 << 20) if gen >= 7 else (128 << 20)
    return vmem_cap, gen


def _vmem_limit(needed_bytes, vmem_cap):
    """Explicit scoped-VMEM limit, clamped below physical VMEM with headroom."""
    safe_cap = int(vmem_cap * 0.85)          # headroom for Mosaic internal scratch
    return int(min(safe_cap, max(int(needed_bytes * 1.5) + (4 << 20), 32 << 20)))


def _pick_src_tile(S, cap_rows):
    """Largest divisor of S <= cap_rows that keeps the (TI, H) block
    sublane-aligned (TI % 8 == 0, or TI == S).  Robust for odd-factor S."""
    cands = [d for d in range(1, S + 1)
             if S % d == 0 and (d % 8 == 0 or d == S)]
    fitting = [d for d in cands if d <= cap_rows]
    return max(fitting) if fitting else min(cands)


# ---------------------------------------------------------------------------
# Forward wrapper
# ---------------------------------------------------------------------------
def mhs_forward(x, params, *, activation="relu", src_tile=None):
    """BaseMHSLayer forward.  x: (B, S, E) f32 -> (B, S, R, S) f32."""
    B, S, E = x.shape
    H = params["wu"].shape[0]
    R = params["emb"].shape[0]
    act = _ACT[activation]

    vmem_cap, gen = _chip_info()
    # bf16 pairwise math on chips with packed bf16 VALU (v6e/v7x); f32 on v5e.
    pair_dtype = jnp.bfloat16 if gen >= 6 else jnp.float32
    pb = jnp.dtype(pair_dtype).itemsize

    # Pad num_labels up to a sublane multiple -> unmasked output stores.
    Rp = ((R + 7) // 8) * 8

    # Kernel-friendly parameter layouts (all MXU operands bf16, biases f32).
    wu_t = params["wu"].T.astype(jnp.bfloat16)            # (E, H)
    wv_n = params["wv"].astype(jnp.bfloat16)               # (H, E) native
    w2u_t = params["w2"][:, :H].T.astype(jnp.bfloat16)     # (H, H)
    w2v_n = params["w2"][:, H:].astype(jnp.bfloat16)       # (H, H) native
    bu_r = params["bu"].reshape(1, H).astype(jnp.float32)
    bv_c = params["bv"].reshape(H, 1).astype(jnp.float32)
    b2_r = params["b2"].reshape(1, H).astype(jnp.float32)
    emb_p = params["emb"].astype(jnp.bfloat16)
    if Rp != R:
        emb_p = jnp.pad(emb_p, ((0, Rp - R), (0, 0)))

    x_bf = x.astype(jnp.bfloat16)
    xt_bf = jnp.swapaxes(x_bf, 1, 2)                        # (B, E, S)

    # ---------------- stage 1: per-batch Au / BvT projections --------------
    proj_vmem = (2 * 2 * S * E * 2                  # x, xT blocks (dbl-buffered)
                 + 2 * (2 * E * H + 2 * H * H) * 2  # resident bf16 weights
                 + 2 * 2 * S * H * pb               # Au / BvT output blocks
                 + 4 * S * H * 4 + 2 * S * H * 2)   # u / vT intermediates
    proj_flops = B * (4 * S * E * H + 4 * S * H * H)
    proj_bytes = 2 * B * S * E * 2 + (2 * E * H + 2 * H * H) * 2 + 2 * B * S * H * pb

    au, bvt = pl.pallas_call(
        functools.partial(_proj_kernel, act=act),
        out_shape=(jax.ShapeDtypeStruct((B, S, H), pair_dtype),
                   jax.ShapeDtypeStruct((B, H, S), pair_dtype)),
        grid=(B,),
        in_specs=[
            pl.BlockSpec((None, S, E), lambda b: (b, 0, 0)),   # x
            pl.BlockSpec((None, E, S), lambda b: (b, 0, 0)),   # x^T
            pl.BlockSpec((E, H), lambda b: (0, 0)),            # Wu^T
            pl.BlockSpec((1, H), lambda b: (0, 0)),            # bu
            pl.BlockSpec((H, E), lambda b: (0, 0)),            # Wv (native)
            pl.BlockSpec((H, 1), lambda b: (0, 0)),            # bv (column)
            pl.BlockSpec((H, H), lambda b: (0, 0)),            # W2 (u half)^T
            pl.BlockSpec((H, H), lambda b: (0, 0)),            # W2 (v half)
            pl.BlockSpec((1, H), lambda b: (0, 0)),            # b2
        ],
        out_specs=(pl.BlockSpec((None, S, H), lambda b: (b, 0, 0)),
                   pl.BlockSpec((None, H, S), lambda b: (b, 0, 0))),
        compiler_params=pltpu.CompilerParams(
            dimension_semantics=("parallel",),
            vmem_limit_bytes=_vmem_limit(proj_vmem, vmem_cap)),
        cost_estimate=pl.CostEstimate(flops=int(proj_flops), transcendentals=0,
                                      bytes_accessed=int(proj_bytes)),
    )(x_bf, xt_bf, wu_t, bu_r, wv_n, bv_c, w2u_t, w2v_n, b2_r)

    # ---------------- stage 2: pairwise add+act + emb contraction ----------
    # Per-src-row VMEM cost of one grid step (drives the src tile size).
    per_row = (2 * H * pb                 # Au block (double-buffered)
               + 2 * Rp * H * 2           # pre-broadcast emb block
               + 2 * Rp * S * 4           # output block (double-buffered)
               + H * S * (pb + 2)         # (TI,H,S) pairwise intermediate
               + Rp * S * 4)              # f32 matmul result before store
    step_budget = min(int(vmem_cap * 0.30), 28 << 20)
    if src_tile is None:
        src_tile = _pick_src_tile(S, max(8, step_budget // max(per_row, 1)))
    assert S % src_tile == 0 and (src_tile % 8 == 0 or src_tile == S), src_tile
    ni = S // src_tile

    # emb is pre-broadcast once outside the kernel; the block index is
    # constant so it is DMA'd once per core and never re-broadcast per step.
    embb = jnp.broadcast_to(emb_p[None], (src_tile, Rp, H))

    pair_vmem = 2 * H * S * pb + src_tile * per_row
    pair_flops = B * (2 * S * S * H * Rp + 2 * S * S * H)
    pair_bytes = (B * S * H * pb + B * H * S * pb
                  + src_tile * Rp * H * 2 + B * S * Rp * S * 4)

    out_p = pl.pallas_call(
        functools.partial(_pairwise_kernel, act=act),
        out_shape=jax.ShapeDtypeStruct((B, S, Rp, S), jnp.float32),
        grid=(B, ni),
        in_specs=[
            pl.BlockSpec((None, src_tile, H), lambda b, i: (b, i, 0)),   # Au tile
            pl.BlockSpec((None, H, S), lambda b, i: (b, 0, 0)),          # BvT
            pl.BlockSpec((src_tile, Rp, H), lambda b, i: (0, 0, 0)),     # emb bcast
        ],
        out_specs=pl.BlockSpec((None, src_tile, Rp, S),
                               lambda b, i: (b, i, 0, 0)),
        compiler_params=pltpu.CompilerParams(
            dimension_semantics=("parallel", "parallel"),
            vmem_limit_bytes=_vmem_limit(pair_vmem, vmem_cap)),
        cost_estimate=pl.CostEstimate(flops=int(pair_flops), transcendentals=0,
                                      bytes_accessed=int(pair_bytes)),
    )(au, bvt, embb)

    if Rp != R:
        # TODO(synk): if the consumer tolerates a label-padded layout, return
        # out_p directly and skip this slice (saves one HBM round-trip).
        out_p = out_p[:, :, :R, :]
    return out_p


# ---------------------------------------------------------------------------
# Reference + demo
# ---------------------------------------------------------------------------
def reference_forward(x, p, activation="relu"):
    """Direct JAX translation of the PyTorch forward (f32, for validation)."""
    act = {"relu": jax.nn.relu, "gelu": jax.nn.gelu, "tanh": jnp.tanh}[activation]
    u = act(x @ p["wu"].T + p["bu"])
    v = act(x @ p["wv"].T + p["bv"])
    B, S, H = u.shape
    uu = jnp.broadcast_to(u[:, :, None, :], (B, S, S, H))
    vv = jnp.broadcast_to(v[:, None, :, :], (B, S, S, H))
    uv = act(jnp.concatenate([uu, vv], axis=-1) @ p["w2"].T + p["b2"])
    return jnp.einsum("bijh,rh->birj", uv, p["emb"])


def init_params(key, input_size, hidden, num_labels):
    ks = jax.random.split(key, 7)
    sc = 0.1
    return dict(
        wu=sc * jax.random.normal(ks[0], (hidden, input_size), jnp.float32),
        bu=sc * jax.random.normal(ks[1], (hidden,), jnp.float32),
        wv=sc * jax.random.normal(ks[2], (hidden, input_size), jnp.float32),
        bv=sc * jax.random.normal(ks[3], (hidden,), jnp.float32),
        w2=sc * jax.random.normal(ks[4], (hidden, 2 * hidden), jnp.float32),
        b2=sc * jax.random.normal(ks[5], (hidden,), jnp.float32),
        emb=sc * jax.random.normal(ks[6], (num_labels, hidden), jnp.float32),
    )


if __name__ == "__main__":
    B, S, E_IN, HID, R = 2, 8, 32, 32, 4
    root = jax.random.PRNGKey(0)
    k_param, k_x = jax.random.split(root)

    params = init_params(k_param, E_IN, HID, R)
    x = jax.random.normal(k_x, (B, S, E_IN), jnp.float32)

    out = jax.block_until_ready(mhs_forward(x, params))
    assert out.shape == (B, S, R, S), out.shape

    ref = reference_forward(x, params)
    # bf16 MXU operands vs f32 reference -> loose-but-safe tolerance.
    if not bool(jnp.allclose(out, ref, atol=1e-2, rtol=5e-2)):
        max_err = float(jnp.max(jnp.abs(out - ref)))
        raise SystemExit(f"kernel/reference mismatch (max abs err {max_err:.3e})")
    print("KERNEL_OK")
</pallas_src>

<mosaic_0001>
module attributes {stable_mosaic.version = 11 : i64} {
  func.func @_proj_kernel(%arg0: i32, %arg1: memref<1x8x32xbf16, #tpu.memory_space<vmem>>, %arg2: memref<1x32x8xbf16, #tpu.memory_space<vmem>>, %arg3: memref<32x32xbf16, #tpu.memory_space<vmem>>, %arg4: memref<1x32xf32, #tpu.memory_space<vmem>>, %arg5: memref<32x32xbf16, #tpu.memory_space<vmem>>, %arg6: memref<32x1xf32, #tpu.memory_space<vmem>>, %arg7: memref<32x32xbf16, #tpu.memory_space<vmem>>, %arg8: memref<32x32xbf16, #tpu.memory_space<vmem>>, %arg9: memref<1x32xf32, #tpu.memory_space<vmem>>, %arg10: memref<1x8x32xbf16, #tpu.memory_space<vmem>>, %arg11: memref<1x32x8xbf16, #tpu.memory_space<vmem>>) attributes {dimension_semantics = [#tpu.dimension_semantics<parallel>], iteration_bounds = array<i64: 2>, scalar_prefetch = 0 : i64, scratch_operands = 0 : i64, tpu.core_type = #tpu.core_type<tc>, window_params = [{transform_indices = @transform_0, window_bounds = array<i64: 1, 8, 32>}, {transform_indices = @transform_1, window_bounds = array<i64: 1, 32, 8>}, {pipeline_mode = #tpu.pipeline_mode<synchronous>, transform_indices = @transform_2, window_bounds = array<i64: 32, 32>}, {pipeline_mode = #tpu.pipeline_mode<synchronous>, transform_indices = @transform_3, window_bounds = array<i64: 1, 32>}, {pipeline_mode = #tpu.pipeline_mode<synchronous>, transform_indices = @transform_4, window_bounds = array<i64: 32, 32>}, {pipeline_mode = #tpu.pipeline_mode<synchronous>, transform_indices = @transform_5, window_bounds = array<i64: 32, 1>}, {pipeline_mode = #tpu.pipeline_mode<synchronous>, transform_indices = @transform_6, window_bounds = array<i64: 32, 32>}, {pipeline_mode = #tpu.pipeline_mode<synchronous>, transform_indices = @transform_7, window_bounds = array<i64: 32, 32>}, {pipeline_mode = #tpu.pipeline_mode<synchronous>, transform_indices = @transform_8, window_bounds = array<i64: 1, 32>}, {transform_indices = @transform_9, window_bounds = array<i64: 1, 8, 32>}, {transform_indices = @transform_10, window_bounds = array<i64: 1, 32, 8>}]} {
    %c0 = arith.constant 0 : index
    %c0_0 = arith.constant 0 : index
    %c0_1 = arith.constant 0 : index
    %0 = vector.load %arg1[%c0, %c0_0, %c0_1] : memref<1x8x32xbf16, #tpu.memory_space<vmem>>, vector<1x8x32xbf16>
    %1 = vector.shape_cast %0 : vector<1x8x32xbf16> to vector<8x32xbf16>
    %c0_2 = arith.constant 0 : index
    %c0_3 = arith.constant 0 : index
    %2 = vector.load %arg3[%c0_2, %c0_3] : memref<32x32xbf16, #tpu.memory_space<vmem>>, vector<32x32xbf16>
    %cst = arith.constant dense<0.000000e+00> : vector<8x32xf32>
    %3 = tpu.matmul %1, %2, %cst {dimension_numbers = #tpu.dot_dimension_numbers<[1], [0], [0], [1], [0, 0, 1, 1], [], []>} : vector<8x32xbf16>, vector<32x32xbf16>, vector<8x32xf32> -> vector<8x32xf32>
    %c0_4 = arith.constant 0 : index
    %c0_5 = arith.constant 0 : index
    %4 = vector.load %arg4[%c0_4, %c0_5] : memref<1x32xf32, #tpu.memory_space<vmem>>, vector<1x32xf32>
    %5 = vector.broadcast %4 : vector<1x32xf32> to vector<8x32xf32>
    %6 = arith.addf %3, %5 : vector<8x32xf32>
    %cst_6 = arith.constant 0.000000e+00 : f32
    %7 = vector.broadcast %cst_6 : f32 to vector<8x32xf32>
    %8 = arith.maximumf %6, %7 : vector<8x32xf32>
    %c0_7 = arith.constant 0 : index
    %c0_8 = arith.constant 0 : index
    %9 = vector.load %arg5[%c0_7, %c0_8] : memref<32x32xbf16, #tpu.memory_space<vmem>>, vector<32x32xbf16>
    %c0_9 = arith.constant 0 : index
    %c0_10 = arith.constant 0 : index
    %c0_11 = arith.constant 0 : index
    %10 = vector.load %arg2[%c0_9, %c0_10, %c0_11] : memref<1x32x8xbf16, #tpu.memory_space<vmem>>, vector<1x32x8xbf16>
    %11 = vector.shape_cast %10 : vector<1x32x8xbf16> to vector<32x8xbf16>
    %cst_12 = arith.constant dense<0.000000e+00> : vector<32x8xf32>
    %12 = tpu.matmul %9, %11, %cst_12 {dimension_numbers = #tpu.dot_dimension_numbers<[1], [0], [0], [1], [0, 0, 1, 1], [], []>} : vector<32x32xbf16>, vector<32x8xbf16>, vector<32x8xf32> -> vector<32x8xf32>
    %c0_13 = arith.constant 0 : index
    %c0_14 = arith.constant 0 : index
    %13 = vector.load %arg6[%c0_13, %c0_14] : memref<32x1xf32, #tpu.memory_space<vmem>>, vector<32x1xf32>
    %14 = vector.broadcast %13 : vector<32x1xf32> to vector<32x8xf32>
    %15 = arith.addf %12, %14 : vector<32x8xf32>
    %cst_15 = arith.constant 0.000000e+00 : f32
    %16 = vector.broadcast %cst_15 : f32 to vector<32x8xf32>
    %17 = arith.maximumf %15, %16 : vector<32x8xf32>
    %18 = arith.truncf %8 : vector<8x32xf32> to vector<8x32xbf16>
    %c0_16 = arith.constant 0 : index
    %c0_17 = arith.constant 0 : index
    %19 = vector.load %arg7[%c0_16, %c0_17] : memref<32x32xbf16, #tpu.memory_space<vmem>>, vector<32x32xbf16>
    %cst_18 = arith.constant dense<0.000000e+00> : vector<8x32xf32>
    %20 = tpu.matmul %18, %19, %cst_18 {dimension_numbers = #tpu.dot_dimension_numbers<[1], [0], [0], [1], [0, 0, 1, 1], [], []>} : vector<8x32xbf16>, vector<32x32xbf16>, vector<8x32xf32> -> vector<8x32xf32>
    %c0_19 = arith.constant 0 : index
    %c0_20 = arith.constant 0 : index
    %21 = vector.load %arg9[%c0_19, %c0_20] : memref<1x32xf32, #tpu.memory_space<vmem>>, vector<1x32xf32>
    %22 = vector.broadcast %21 : vector<1x32xf32> to vector<8x32xf32>
    %23 = arith.addf %20, %22 : vector<8x32xf32>
    %c0_21 = arith.constant 0 : index
    %c0_22 = arith.constant 0 : index
    %24 = vector.load %arg8[%c0_21, %c0_22] : memref<32x32xbf16, #tpu.memory_space<vmem>>, vector<32x32xbf16>
    %25 = arith.truncf %17 : vector<32x8xf32> to vector<32x8xbf16>
    %cst_23 = arith.constant dense<0.000000e+00> : vector<32x8xf32>
    %26 = tpu.matmul %24, %25, %cst_23 {dimension_numbers = #tpu.dot_dimension_numbers<[1], [0], [0], [1], [0, 0, 1, 1], [], []>} : vector<32x32xbf16>, vector<32x8xbf16>, vector<32x8xf32> -> vector<32x8xf32>
    %27 = arith.truncf %23 : vector<8x32xf32> to vector<8x32xbf16>
    %c0_24 = arith.constant 0 : index
    %c0_25 = arith.constant 0 : index
    %c0_26 = arith.constant 0 : index
    %28 = vector.load %arg10[%c0_24, %c0_25, %c0_26] : memref<1x8x32xbf16, #tpu.memory_space<vmem>>, vector<1x8x32xbf16>
    %29 = vector.shape_cast %28 : vector<1x8x32xbf16> to vector<8x32xbf16>
    %30 = vector.shape_cast %27 : vector<8x32xbf16> to vector<1x8x32xbf16>
    tpu.vector_store %arg10[%c0_24, %c0_25, %c0_26], %30 {strides = array<i32>} : memref<1x8x32xbf16, #tpu.memory_space<vmem>>, vector<1x8x32xbf16>,
    %31 = arith.truncf %26 : vector<32x8xf32> to vector<32x8xbf16>
    %c0_27 = arith.constant 0 : index
    %c0_28 = arith.constant 0 : index
    %c0_29 = arith.constant 0 : index
    %32 = vector.load %arg11[%c0_27, %c0_28, %c0_29] : memref<1x32x8xbf16, #tpu.memory_space<vmem>>, vector<1x32x8xbf16>
    %33 = vector.shape_cast %32 : vector<1x32x8xbf16> to vector<32x8xbf16>
    %34 = vector.shape_cast %31 : vector<32x8xbf16> to vector<1x32x8xbf16>
    tpu.vector_store %arg11[%c0_27, %c0_28, %c0_29], %34 {strides = array<i32>} : memref<1x32x8xbf16, #tpu.memory_space<vmem>>, vector<1x32x8xbf16>,
    return
  }
  func.func @transform_0(%arg0: i32) -> (i32, i32, i32) {
    %c0_i32 = arith.constant 0 : i32
    %c0_i32_0 = arith.constant 0 : i32
    %c0_i32_1 = arith.constant 0 : i32
    return %arg0, %c0_i32, %c0_i32_0 : i32, i32, i32
  }
  func.func @transform_1(%arg0: i32) -> (i32, i32, i32) {
    %c0_i32 = arith.constant 0 : i32
    %c0_i32_0 = arith.constant 0 : i32
    %c0_i32_1 = arith.constant 0 : i32
    return %arg0, %c0_i32, %c0_i32_0 : i32, i32, i32
  }
  func.func @transform_2(%arg0: i32) -> (i32, i32) {
    %c0_i32 = arith.constant 0 : i32
    %c0_i32_0 = arith.constant 0 : i32
    %c0_i32_1 = arith.constant 0 : i32
    return %c0_i32, %c0_i32_0 : i32, i32
  }
  func.func @transform_3(%arg0: i32) -> (i32, i32) {
    %c0_i32 = arith.constant 0 : i32
    %c0_i32_0 = arith.constant 0 : i32
    %c0_i32_1 = arith.constant 0 : i32
    return %c0_i32, %c0_i32_0 : i32, i32
  }
  func.func @transform_4(%arg0: i32) -> (i32, i32) {
    %c0_i32 = arith.constant 0 : i32
    %c0_i32_0 = arith.constant 0 : i32
    %c0_i32_1 = arith.constant 0 : i32
    return %c0_i32, %c0_i32_0 : i32, i32
  }
  func.func @transform_5(%arg0: i32) -> (i32, i32) {
    %c0_i32 = arith.constant 0 : i32
    %c0_i32_0 = arith.constant 0 : i32
    %c0_i32_1 = arith.constant 0 : i32
    return %c0_i32, %c0_i32_0 : i32, i32
  }
  func.func @transform_6(%arg0: i32) -> (i32, i32) {
    %c0_i32 = arith.constant 0 : i32
    %c0_i32_0 = arith.constant 0 : i32
    %c0_i32_1 = arith.constant 0 : i32
    return %c0_i32, %c0_i32_0 : i32, i32
  }
  func.func @transform_7(%arg0: i32) -> (i32, i32) {
    %c0_i32 = arith.constant 0 : i32
    %c0_i32_0 = arith.constant 0 : i32
    %c0_i32_1 = arith.constant 0 : i32
    return %c0_i32, %c0_i32_0 : i32, i32
  }
  func.func @transform_8(%arg0: i32) -> (i32, i32) {
    %c0_i32 = arith.constant 0 : i32
    %c0_i32_0 = arith.constant 0 : i32
    %c0_i32_1 = arith.constant 0 : i32
    return %c0_i32, %c0_i32_0 : i32, i32
  }
  func.func @transform_9(%arg0: i32) -> (i32, i32, i32) {
    %c0_i32 = arith.constant 0 : i32
    %c0_i32_0 = arith.constant 0 : i32
    %c0_i32_1 = arith.constant 0 : i32
    return %arg0, %c0_i32, %c0_i32_0 : i32, i32, i32
  }
  func.func @transform_10(%arg0: i32) -> (i32, i32, i32) {
    %c0_i32 = arith.constant 0 : i32
    %c0_i32_0 = arith.constant 0 : i32
    %c0_i32_1 = arith.constant 0 : i32
    return %arg0, %c0_i32, %c0_i32_0 : i32, i32, i32
  }
}

</mosaic_0001>

<bundles_post_ra>
// kernel: tpu_custom_call.1
= control target key start
LH: loop header
LB: loop body
LE: loop exit
PB: predicated region body
PF: predicated region fallthrough
CT: control target
= control target key end

     0   :  { %s1277_s0 = inlined_call_operand.vmem [shape: bf16[2,8,32], index: 0, kind: input, shape index: {}]   ;;  %s1278_s1 = inlined_call_operand.vmem [shape: bf16[2,32,8], index: 1, kind: input, shape index: {}]   ;;  %s1279_s2 = inlined_call_operand.vmem [shape: bf16[32,32], index: 2, kind: input, shape index: {}]   ;;  %s1280_s3 = inlined_call_operand.vmem [shape: f32[1,32], index: 3, kind: input, shape index: {}]   ;;  %s1281_s4 = inlined_call_operand.vmem [shape: bf16[32,32], index: 4, kind: input, shape index: {}]   ;;  %s1282_s5 = inlined_call_operand.vmem [shape: f32[32,1], index: 5, kind: input, shape index: {}]   ;;  %s1283_s6 = inlined_call_operand.vmem [shape: bf16[32,32], index: 6, kind: input, shape index: {}]   ;;  %s1284_s7 = inlined_call_operand.vmem [shape: bf16[32,32], index: 7, kind: input, shape index: {}]   ;;  %s1285_s8 = inlined_call_operand.vmem [shape: f32[1,32], index: 8, kind: input, shape index: {}]   ;;  %s1286_s9 = inlined_call_operand.hbm [shape: bf16[2,8,32], index: 9, kind: output, shape index: {0}]   ;;  %s1287_s10 = inlined_call_operand.vmem [shape: bf16[2,32,8], index: 10, kind: output, shape index: {1}]  }
   0x1   :  { %1288 = sst [smem:[#allocation6_spill]] %s1279_s2 }
   0x2   :  { %16 = vsyncpa [#allocation3], 0 }
   0x3   :  { %18 = vsyncpa [#allocation3 + $0x1], 0  ;;  %s1114_s13 = smov 0   ;;  %s1116_s14 = smov 0  }
   0x4   :  { %s1118_s15 = smov 0   ;;  %s1120_s16 = smov 0  }
   0x5 LB: > { %s1135_s17 = sadd.s32 4294967295, %s1053_s16   ;;  %s851_s18 = sadd.s32 4294967294, %s1053_s16   ;;  %s1053_s16 = sphi %s1120_s16, %s1297_s16   ;;  %s1049_s15 = sphi %s1118_s15, %s1296_s15   ;;  %s1045_s14 = sphi %s1116_s14, %s1295_s14   ;;  %s1041_s13 = sphi %s1114_s13, %s1294_s13  }
   0x6   : > { %s1139_s19 = sadd.s32 1, %s1053_s16   ;;  %s230_s20 = sadd.s32 1, %s1049_s15 }
   0x7   : > { %s227_s21 = ssub.s32 %s1053_s16, %s1139_s19  ;;  %p240_p0 = scmp.ne.s32.totalorder %s1049_s15, %s1045_s14 }
   0x8   : > { %p228_p1 = scmp.eq.s32.totalorder %s227_s21, 0  ;;  %p241_p2 = scmp.eq.s32.totalorder %s1135_s17, 1 }
   0x9   : > { %p246_p3 = scmp.ne.s32.totalorder %s1045_s14, %s1041_s13  ;;  %p247_p4 = scmp.eq.s32.totalorder %s851_s18, 1 }
   0xa   : > { %s1150_s22 = scalar_select %p228_p1, %s1049_s15, %s230_s20  }
   0xb   : > { %p1152_p5 = por %p241_p2, %p240_p0  ;;  %p1156_p6 = por %p247_p4, %p246_p3 }
   0xc   : > { %1289 = sst [smem:[#allocation5_spill]] %s1150_s22  ;;  %p854_p7 = scmp.ge.s32.totalorder %s1053_s16, 1 }
   0xd   : > { %p327_p8 = scmp.lt.s32.totalorder %s1053_s16, 3 }
   0xf   : > { %p328_p9 = pnand %p854_p7, %p327_p8 }
  0x10   : > { %p374_p10 = scmp.lt.s32.totalorder (!%p328_p9), %s1135_s17, 1  ;;  %s1292_s2 = sld [smem:[#allocation6_spill]] (!%p328_p9) }
  0x11   : > { %331 = sbr.rel (%p328_p9) target bundleno = 450 (0x1c2), region = 56  ;;  %s364_s29 = sand.u32 (!%p328_p9), 1, %s1045_s14  }
  0x12   : > { %s884_s11 = sshll.u32 (!%p328_p9), %s1135_s17, 6 }
  0x13   : > { %s1231_s26 = scalar_lea.hbm (!%p328_p9), %s1286_s9, %s884_s11 }
  0x16   : > { %vm413_vm0 = vcmask 261120   ;;  %v985_v0 = vld [vmem:[%s1281_s4] sm:$0xff]   ;;  %s1167_s27 = scalar_select %p374_p10, %s1135_s17, 1  ;;  %v1055_v1 = vmov 0.0   ;;  %v987_v2 = vld [vmem:[%s1292_s2 + $0x8] sm:$0xff]   ;;  %vm1056_vm1 = vmmov 0  }
  0x17   : > { %907 = vmatprep.subr.bf16.mxu0 %v1055_v1  ;;  %919 = vmatprep.mubr.msk.bf16.mxu1 %vm413_vm0, %v985_v0  ;;  %v988_v3 = vld [vmem:[%s1292_s2] sm:$0xff]   ;;  %v468_v4 = vld [vmem:[%s1282_s5 + $0x10] sm:$0xff]  ;;  %v1057_v5 = vmov 0   ;;  %v469_v6 = vld [vmem:[%s1282_s5 + $0x18] sm:$0xff]  ;;  %vm710_vm2 = vcmask 257024   ;;  %s734_s17 = scalar_lea.sflag [#allocation3], %s364_s29 }
  0x18   : > { %s887_s30 = sshll.u32 %s1167_s27, 4  ;;  %911 = vmatprep.mubr.msk.bf16.mxu0 %vm1056_vm1, %v1055_v1  ;;  %s856_s18 = sshll.u32 %s1167_s27, 2  ;;  %908 = vmatpush3.bf16.msra.mxu0 %v987_v2  ;;  %v466_v7 = vld [vmem:[%s1282_s5] sm:$0xff]  ;;  %v467_v10 = vld [vmem:[%s1282_s5 + $0x8] sm:$0xff] }
  0x19   : > { %s382_s22 = scalar_lea.vmem %s1278_s1, %s887_s30  ;;  %981 = vset.pattern.permute.xlu0 %v1057_v5  ;;  %909 = vmatprep.subr.bf16.mxu0 %v1055_v1  ;;  %s377_s2 = scalar_lea.vmem %s1277_s0, %s856_s18  ;;  %v986_v12 = vld [vmem:[%s1281_s4 + $0x8] sm:$0xff]   ;;  %v990_v14 = vld [vmem:[%s1283_s6] sm:$0xff]  }
  0x1a   : > { %v983_v8 = vld [vmem:[%s382_s22 + $0x8] sm:$0xff]   ;;  %482 = vperm.xlu0 %981, %v468_v4   ;;  %v984_v9 = vld [vmem:[%s382_s22] sm:$0xff]   ;;  %982 = vset.pattern.permute.xlu1 %v1057_v5  ;;  %s855_s22 = sshll.u32 %s364_s29, 2 }
  0x1b   : > { %915 = vmatprep.subr.bf16.mxu1 %v983_v8  ;;  %v389_v11 = vld [vmem:[%s377_s2] sm:$0xf]  ;;  %472 = vperm.xlu1 %982, %v466_v7   ;;  %v989_v13 = vld [vmem:[%s1283_s6 + $0x8] sm:$0xff]   ;;  %s366_s12 = scalar_lea.vmem [#allocation2], %s855_s22  ;;  %s1058_s22 = smov [#allocation2]  }
  0x1c   : > { %916 = vmatpush3.bf16.msra.mxu1 %v983_v8  ;;  %910 = vmatpush3.bf16.msra.mxu0 %v988_v3  ;;  %v991_v15 = vld [vmem:[%s1284_s7] sm:$0xff]   ;;  %v992_v42 = vld [vmem:[%s1284_s7 + $0x8] sm:$0xff]   ;;  %s752_s20 = sshll.u32 %s366_s12, 4  ;;  %s997_s2 = sshll.u32 %s1058_s22, 4  ;;  %s1233_s20 = int_to_ptr.vmem [resolvable:$true] %s752_s20  ;;  %s998_s2 = int_to_ptr.vmem [resolvable:$false] %s997_s2 }
  0x1d   : > { %917 = vmatprep.subr.bf16.mxu1 %v984_v9  ;;  %923 = vmatprep.subr.bf16.mxu0 %v1055_v1  ;;  %v861_v16 = vld [vmem:[%s1280_s3] ss:$0 sm:$0xff]  ;;  %s993_s28 = scalar_lea.vmem %s1233_s20, 64  ;;  %s999_s18 = scalar_lea.vmem %s998_s2, 128 }
  0x1e   : > { %487 = vperm.xlu0 %981, %v469_v6   ;;  %v871_v43 = vld [vmem:[%s1285_s8] ss:$0 sm:$0xff]  ;;  %p994_p11 = scmp.ne.s32.totalorder %s1233_s20, %s993_s28  ;;  %p1000_p0 = scmp.lt.s32.totalorder %s1233_s20, %s998_s2 }
  0x1f   : > { %912 = vmatmul.mubr.msk.bf16.vlgmr.msra.gmra.mxu0 %vm413_vm0, %v389_v11  ;;  %477 = vperm.xlu1 %982, %v467_v10   ;;  %p1001_p1 = scmp.lt.s32.totalorder %s999_s18, %s993_s28 }
  0x20   : > { %918 = vmatpush3.bf16.msra.mxu1 %v984_v9  ;;  %927 = vmatprep.mubr.msk.bf16.mxu0 %vm1056_vm1, %v1055_v1  ;;  %p995_p12 = pnand %p994_p11, %p1152_p5 }
  0x21   : > { %924 = vmatpush3.bf16.msra.mxu0 %v989_v13  ;;  %p1002_p2 = por %p1001_p1, %p1000_p0 }
  0x22   : > { %925 = vmatprep.subr.bf16.mxu0 %v1055_v1  ;;  %p996_p13 = pneg %p995_p12 }
  0x23   : > { %920 = vmatmul.mubr.msk.bf16.vlgmr.msra.gmra.mxu1 %vm413_vm0, %v986_v12 }
  0x24   : > { %935 = vmatprep.mubr.msk.bf16.mxu1 %vm413_vm0, %v991_v15  ;;  %p1003_p3 = pnand %p1002_p2, %p996_p13 }
  0x25   : > { %926 = vmatpush3.bf16.msra.mxu0 %v990_v14 }
  0x95   : > { %v483_v19 = vpop.permute.xlu0 %482 }
  0x96   : > { %v473_v21 = vpop.permute.xlu1 %472 }
  0x99   : > { %v488_v29 = vpop.permute.xlu0 %487 }
  0x9a   : > { %v478_v33 = vpop.permute.xlu1 %477 }
  0xdf   : > { %v451_v17 = vpop.f32.mrf.mxu0 }
  0xe0   : > { %v452_v18 = vadd.f32 %v861_v16, %v451_v17 }
  0xe1   : > { %v913_v20 = vpop.f32.mrf.mxu0 }
  0xe2   : > { %v457_v22 = vmax.f32 %v452_v18, 0.0 }
  0xe3   : > { %v921_v23 = vpop.f32.mrf.mxu1  ;;  %v454_v24 = vpop.f32.mrf.mxu0 }
  0xe4   : > { %v571_v25 = vpack.c.bf16 %v457_v22, %v457_v22  ;;  %v561_v28 = vadd.f32 %v921_v23, %v483_v19 }
  0xe5   : > { %v552_v26 = vpop.f32.mrf.mxu1  ;;  %v914_v27 = vpop.f32.mrf.mxu0 }
  0xe6   : > { %928 = vmatmul.mubr.msk.bf16.vlgmr.msra.gmra.mxu0 %vm413_vm0, %v571_v25  ;;  %v553_v31 = vadd.f32 %v552_v26, %v473_v21  ;;  %v569_v35 = vmax.f32 %v561_v28, 0.0 }
  0xe7   : > { %v922_v30 = vpop.f32.mrf.mxu1 }
  0xe8   : > { %v564_v32 = vadd.f32 %v922_v30, %v488_v29  ;;  %v567_v38 = vmax.f32 %v553_v31, 0.0 }
  0xe9   : > { %v555_v34 = vpop.f32.mrf.mxu1 }
  0xea   : > { %v570_v36 = vmax.f32 %v564_v32, 0.0  ;;  %v556_v37 = vadd.f32 %v555_v34, %v478_v33 }
  0xec   : > { %v643_v39 = vpack.c.bf16 %v570_v36, %v569_v35  ;;  %v568_v40 = vmax.f32 %v556_v37, 0.0 }
  0xee   : > { %v642_v41 = vpack.c.bf16 %v568_v40, %v567_v38  ;;  %931 = vmatprep.subr.bf16.mxu1 %v643_v39 }
  0xef   : > { %932 = vmatpush3.bf16.msra.mxu1 %v643_v39 }
  0xf0   : > { %933 = vmatprep.subr.bf16.mxu1 %v642_v41 }
  0xf3   : > { %934 = vmatpush3.bf16.msra.mxu1 %v642_v41 }
  0xf6   : > { %936 = vmatmul.mubr.msk.bf16.vlgmr.msra.gmra.mxu1 %vm413_vm0, %v992_v42 }
 0x1a6   : > { %v632_v44 = vpop.f32.mrf.mxu0 }
 0x1a7   : > { %v633_v45 = vadd.f32 %v871_v43, %v632_v44 }
 0x1a8   : > { %v929_v46 = vpop.f32.mrf.mxu0 }
 0x1a9   : > { %v709_v47 = vpack.c.bf16 %v633_v45, %v633_v45 }
 0x1aa   : > { %v635_v48 = vpop.f32.mrf.mxu0 }
 0x1ab   : > { %711 = vst.msk [vmem:[%s366_s12] sm:$0xf] %vm710_vm2, %v709_v47 }
 0x1ac   : > { %v930_v49 = vpop.f32.mrf.mxu0 }
 0x1ad   : > { %1006 = shalt.err (!%p1003_p3)
}
 0x1ae   : > { %s1007_s11 = scalar_lea.hbm %s1231_s26, 64  ;;  %s1011_s21 = scalar_lea.hbm %s1286_s9, 128 }
 0x1af   : > { %p1008_p4 = scmp.ne.s32.totalorder %s1231_s26, %s1007_s11  ;;  %p1012_p9 = scmp.lt.s32.totalorder %s1231_s26, %s1286_s9 }
 0x1b0   : > { %p1013_p10 = scmp.lt.s32.totalorder %s1011_s21, %s1007_s11 }
 0x1b1   : > { %p1009_p7 = pnand %p1008_p4, %p1152_p5 }
 0x1b2   : > { %p1014_p11 = por %p1013_p10, %p1012_p9 }
 0x1b3   : > { %p1010_p8 = pneg %p1009_p7 }
 0x1b5   : > { %p1015_p12 = pnand %p1014_p11, %p1010_p8 }
 0x1b7   : > { %1018 = shalt.err (!%p1015_p12)
}
 0x1b8   : > { %939 = dma.vmem_to_hbm [thread:$0]  (%p1152_p5), %s1233_s20, 64, %s1231_s26, %s734_s17   ;;  %v937_v50 = vpop.f32.mrf.mxu1  ;;  %vm728_vm3 = vcmask 60416  }
 0x1b9   : > { %s387_s18 = scalar_lea.vmem %s1287_s10, %s887_s30  ;;  %v891_v51 = vpack.c.bf16 %v937_v50, %v937_v50 }
 0x1ba   : > { %v694_v52 = vpop.f32.mrf.mxu1 }
 0x1bb   : > { %731 = vst.msk [vmem:[%s387_s18 + $0x8] sm:$0xf] %vm728_vm3, %v891_v51  ;;  %v889_v53 = vpack.c.bf16 %v694_v52, %v694_v52 }
 0x1bc   : > { %v938_v54 = vpop.f32.mrf.mxu1 }
 0x1bd   : > { %729 = vst.msk [vmem:[%s387_s18] sm:$0xf] %vm728_vm3, %v889_v53  ;;  %v892_v55 = vpack.c.bf16 %v938_v54, %v938_v54 }
 0x1be   : > { %v697_v56 = vpop.f32.mrf.mxu1 }
 0x1bf   : > { %732 = vst.msk [vmem:[%s387_s18 + $0xc] sm:$0xf] %vm728_vm3, %v892_v55  ;;  %v890_v57 = vpack.c.bf16 %v697_v56, %v697_v56 }
 0x1c1   : > { %730 = vst.msk [vmem:[%s387_s18 + $0x4] sm:$0xf] %vm728_vm3, %v890_v57 }
 0x1c2 PF: > { %p945_p5 = scmp.ge.s32.totalorder %s1053_s16, 2  ;;  %s767_s23 = sand.u32 1, %s1041_s13  }
 0x1c3   : > { %s768_s27 = scalar_lea.sflag [#allocation3], %s767_s23 }
 0x1c4   : > { %p942_p13 = pnand %p945_p5, %p1156_p6 }
 0x1c6   : > { %p943_p0 = pneg %p942_p13 }
 0x1c8   : > { %1036 = dma.done.wait (%p943_p0), %s768_s27, 64  }
 0x1c9   : > { %1038 = vsyncadd (%p943_p0), %s768_s27, 4294967232  ;;  %s1293_s30 = sld [smem:[#allocation5_spill]]  ;;  %p21_p1 = scmp.ge.s32.totalorder %s1139_s19, 4  }
 0x1ca   : > { %s1294_s13 = smov %s1045_s14  ;;  %s1295_s14 = smov %s1049_s15 }
 0x1cb   : > { %s1297_s16 = smov %s1139_s19  ;;  %23 = sbr.rel (!%p21_p1) target bundleno = 5 (0x5), region = 106 }
 0x1cf   : > { %s1296_s15 = smov %s1293_s30 }
 0x1d0   :  { %781 = vsyncpa [#allocation3], 1 }
 0x1d1   :  { %783 = vsyncpa [#allocation3 + $0x1], 1 }

</bundles_post_ra>
